<compile_context>
chip_gen: v7x
topology: tpu7x:2x2x1
jax: 0.10.0
libtpu: 0.0.40
codegen_flags: <defaults>
</compile_context>

<pallas_src>
import functools

import jax
import jax.numpy as jnp
from jax import lax
from jax.experimental import pallas as pl
from jax.experimental.pallas import tpu as pltpu

_LANE = 128
_SUBLANE = 8


def _ggnn_kernel(feat_ref, ain_ref, aout_ref,
                 w_fin_ref, b_fin_ref, w_fout_ref, b_fout_ref,
                 w_ri_ref, w_ro_ref, w_zi_ref, w_zo_ref, w_ni_ref, w_no_ref,
                 u_r_ref, u_z_ref, u_n_ref,
                 b_r_ref, b_z_ref, b_ni_ref, b_nh_ref,
                 out_ref, *, num_steps):
    """All num_steps GGNN propagation steps with weights/adjacency VMEM-resident."""
    a_in_mat = ain_ref[...]          # (Np, Np) row-normalized A
    a_out_mat = aout_ref[...]        # (Np, Np) row-normalized A^T
    w_fin, b_fin = w_fin_ref[...], b_fin_ref[...]
    w_fout, b_fout = w_fout_ref[...], b_fout_ref[...]
    w_ri, w_ro = w_ri_ref[...], w_ro_ref[...]
    w_zi, w_zo = w_zi_ref[...], w_zo_ref[...]
    w_ni, w_no = w_ni_ref[...], w_no_ref[...]
    u_r, u_z, u_n = u_r_ref[...], u_z_ref[...], u_n_ref[...]
    b_r, b_z = b_r_ref[...], b_z_ref[...]
    b_ni, b_nh = b_ni_ref[...], b_nh_ref[...]

    def dot(a, b):
        return jnp.dot(a, b, preferred_element_type=jnp.float32)

    def step(_, h):
        # fc_in / fc_out
        f_in = dot(h, w_fin) + b_fin
        f_out = dot(h, w_fout) + b_fout
        # mean aggregation over in-edges of g / rg
        a_i = dot(a_in_mat, f_in)
        a_o = dot(a_out_mat, f_out)
        # GRUCell(a = [a_i | a_o], h) with pre-split per-gate weights
        r = jax.nn.sigmoid(dot(a_i, w_ri) + dot(a_o, w_ro) + dot(h, u_r) + b_r)
        z = jax.nn.sigmoid(dot(a_i, w_zi) + dot(a_o, w_zo) + dot(h, u_z) + b_z)
        n = jnp.tanh(dot(a_i, w_ni) + dot(a_o, w_no) + b_ni
                     + r * (dot(h, u_n) + b_nh))
        return (1.0 - z) * n + z * h

    out_ref[...] = lax.fori_loop(0, num_steps, step, feat_ref[...], unroll=True)


def _round_up(x, m):
    return (x + m - 1) // m * m


def _pad2(x, rows, cols):
    r, c = x.shape
    return jnp.pad(x, ((0, rows - r), (0, cols - c)))


@functools.partial(jax.jit, static_argnames=("num_steps",))
def ggnn_forward(feat, adj, params, num_steps=1):
    """GGNN.forward (batch_norm=None, feat_drop=None, activation=None).

    feat: (N, H) float32 node features
    adj : (N, N) float32, adj[i, j] = 1 iff edge j -> i in g
    """
    N, H = feat.shape
    Np = _round_up(max(N, _SUBLANE), _SUBLANE)
    Hp = _round_up(max(H, _LANE), _LANE)

    # Row-normalized aggregation matrices (mean over in-edges; zero-degree -> 0).
    indeg = jnp.sum(adj, axis=1, keepdims=True)
    a_in_mat = adj / jnp.maximum(indeg, 1.0)
    adj_t = adj.T
    outdeg = jnp.sum(adj_t, axis=1, keepdims=True)
    a_out_mat = adj_t / jnp.maximum(outdeg, 1.0)

    # fc_in / fc_out: pre-transpose so kernel matmuls are row-major dots.
    w_fin = params["w_in"].T                 # (H, H)
    w_fout = params["w_out"].T               # (H, H)
    b_fin = params["b_in"].reshape(1, H)
    b_fout = params["b_out"].reshape(1, H)

    # GRU weights: split per gate (r, z, n), and split the ih weights into the
    # a_in / a_out halves so the kernel never concatenates or slices on lanes.
    w_ih = params["weight_ih"]               # (3H, 2H)
    w_hh = params["weight_hh"]               # (3H, H)
    b_ih = params["bias_ih"]
    b_hh = params["bias_hh"]

    def gate(w, g):                          # -> (in_dim, H) block for gate g
        return w[g * H:(g + 1) * H, :].T

    w_ih_r, w_ih_z, w_ih_n = gate(w_ih, 0), gate(w_ih, 1), gate(w_ih, 2)  # (2H, H)
    w_ri, w_ro = w_ih_r[:H], w_ih_r[H:]
    w_zi, w_zo = w_ih_z[:H], w_ih_z[H:]
    w_ni, w_no = w_ih_n[:H], w_ih_n[H:]
    u_r, u_z, u_n = gate(w_hh, 0), gate(w_hh, 1), gate(w_hh, 2)           # (H, H)

    # Fold r/z biases; n-gate hidden bias stays separate (scaled by r).
    b_r = (b_ih[:H] + b_hh[:H]).reshape(1, H)
    b_z = (b_ih[H:2 * H] + b_hh[H:2 * H]).reshape(1, H)
    b_ni = b_ih[2 * H:].reshape(1, H)
    b_nh = b_hh[2 * H:].reshape(1, H)

    # Zero-pad everything to lane-dense / sublane-aligned shapes. Padded rows
    # never feed real rows (zero adjacency columns) and padded feature columns
    # stay exactly zero through every step (all padded weights/biases are 0).
    feat_p = _pad2(feat, Np, Hp)
    a_in_p = _pad2(a_in_mat, Np, Np)
    a_out_p = _pad2(a_out_mat, Np, Np)
    hh_mats = [_pad2(m, Hp, Hp) for m in
               (w_fin, w_fout, w_ri, w_ro, w_zi, w_zo, w_ni, w_no, u_r, u_z, u_n)]
    (w_fin_p, w_fout_p, w_ri_p, w_ro_p, w_zi_p, w_zo_p,
     w_ni_p, w_no_p, u_r_p, u_z_p, u_n_p) = hh_mats
    biases = [_pad2(v, 1, Hp) for v in (b_fin, b_fout, b_r, b_z, b_ni, b_nh)]
    b_fin_p, b_fout_p, b_r_p, b_z_p, b_ni_p, b_nh_p = biases

    n_inputs = 20
    out_p = pl.pallas_call(
        functools.partial(_ggnn_kernel, num_steps=num_steps),
        out_shape=jax.ShapeDtypeStruct((Np, Hp), jnp.float32),
        in_specs=[pl.BlockSpec(memory_space=pltpu.MemorySpace.VMEM)
                  for _ in range(n_inputs)],
        out_specs=pl.BlockSpec(memory_space=pltpu.MemorySpace.VMEM),
        compiler_params=pltpu.CompilerParams(
            vmem_limit_bytes=48 * 1024 * 1024),
    )(feat_p, a_in_p, a_out_p,
      w_fin_p, b_fin_p, w_fout_p, b_fout_p,
      w_ri_p, w_ro_p, w_zi_p, w_zo_p, w_ni_p, w_no_p,
      u_r_p, u_z_p, u_n_p,
      b_r_p, b_z_p, b_ni_p, b_nh_p)

    return out_p[:N, :H]


def _reference_forward(feat, adj, params, num_steps=1):
    """Pure-JAX reference mirroring the PyTorch module."""
    N, H = feat.shape
    indeg = jnp.sum(adj, axis=1, keepdims=True)
    a_in_mat = adj / jnp.maximum(indeg, 1.0)
    adj_t = adj.T
    outdeg = jnp.sum(adj_t, axis=1, keepdims=True)
    a_out_mat = adj_t / jnp.maximum(outdeg, 1.0)
    h = feat
    for _ in range(num_steps):
        f_in = h @ params["w_in"].T + params["b_in"]
        f_out = h @ params["w_out"].T + params["b_out"]
        a = jnp.concatenate([a_in_mat @ f_in, a_out_mat @ f_out], axis=1)
        gi = a @ params["weight_ih"].T + params["bias_ih"]
        gh = h @ params["weight_hh"].T + params["bias_hh"]
        r = jax.nn.sigmoid(gi[:, :H] + gh[:, :H])
        z = jax.nn.sigmoid(gi[:, H:2 * H] + gh[:, H:2 * H])
        n = jnp.tanh(gi[:, 2 * H:] + r * gh[:, 2 * H:])
        h = (1.0 - z) * n + z * h
    return h


def init_params(key, hidden_dim):
    """Deterministic init matching the module's parameter shapes."""
    H = hidden_dim
    ks = jax.random.split(key, 8)
    s = 1.0 / jnp.sqrt(H)
    return {
        "w_in": jax.random.uniform(ks[0], (H, H), jnp.float32, -s, s),
        "b_in": jax.random.uniform(ks[1], (H,), jnp.float32, -s, s),
        "w_out": jax.random.uniform(ks[2], (H, H), jnp.float32, -s, s),
        "b_out": jax.random.uniform(ks[3], (H,), jnp.float32, -s, s),
        # nn.GRUCell(2H, H): weight_ih (3H, 2H), weight_hh (3H, H)
        "weight_ih": jax.random.uniform(ks[4], (3 * H, 2 * H), jnp.float32, -s, s),
        "weight_hh": jax.random.uniform(ks[5], (3 * H, H), jnp.float32, -s, s),
        "bias_ih": jax.random.uniform(ks[6], (3 * H,), jnp.float32, -s, s),
        "bias_hh": jax.random.uniform(ks[7], (3 * H,), jnp.float32, -s, s),
    }


if __name__ == "__main__":
    N, H = 8, 32          # 8 nodes in the session graph, hidden_dim = 32

    key = jax.random.PRNGKey(0)
    k_feat, k_adj, k_par = jax.random.split(key, 3)

    feat = jax.random.normal(k_feat, (N, H), jnp.float32)
    # Random directed graph: adj[i, j] = 1 iff edge j -> i.
    adj = (jax.random.uniform(k_adj, (N, N)) < 0.3).astype(jnp.float32)
    adj = adj * (1.0 - jnp.eye(N, dtype=jnp.float32))   # drop self loops

    params = init_params(k_par, H)

    ok = True
    for num_steps in (1, 3):  # default constructor (1) + multi-step in-kernel loop
        out = ggnn_forward(feat, adj, params, num_steps=num_steps)
        out = jax.block_until_ready(out)
        ref = _reference_forward(feat, adj, params, num_steps=num_steps)
        assert out.shape == (N, H)
        ok &= bool(jnp.allclose(out, ref, atol=1e-4, rtol=1e-4))

    assert ok, "mismatch vs reference"
    print("KERNEL_OK")
</pallas_src>

<mosaic_0001>
module attributes {stable_mosaic.version = 11 : i64} {
  func.func @_ggnn_kernel(%arg0: memref<8x128xf32, #tpu.memory_space<vmem>>, %arg1: memref<8x8xf32, #tpu.memory_space<vmem>>, %arg2: memref<8x8xf32, #tpu.memory_space<vmem>>, %arg3: memref<128x128xf32, #tpu.memory_space<vmem>>, %arg4: memref<1x128xf32, #tpu.memory_space<vmem>>, %arg5: memref<128x128xf32, #tpu.memory_space<vmem>>, %arg6: memref<1x128xf32, #tpu.memory_space<vmem>>, %arg7: memref<128x128xf32, #tpu.memory_space<vmem>>, %arg8: memref<128x128xf32, #tpu.memory_space<vmem>>, %arg9: memref<128x128xf32, #tpu.memory_space<vmem>>, %arg10: memref<128x128xf32, #tpu.memory_space<vmem>>, %arg11: memref<128x128xf32, #tpu.memory_space<vmem>>, %arg12: memref<128x128xf32, #tpu.memory_space<vmem>>, %arg13: memref<128x128xf32, #tpu.memory_space<vmem>>, %arg14: memref<128x128xf32, #tpu.memory_space<vmem>>, %arg15: memref<128x128xf32, #tpu.memory_space<vmem>>, %arg16: memref<1x128xf32, #tpu.memory_space<vmem>>, %arg17: memref<1x128xf32, #tpu.memory_space<vmem>>, %arg18: memref<1x128xf32, #tpu.memory_space<vmem>>, %arg19: memref<1x128xf32, #tpu.memory_space<vmem>>, %arg20: memref<8x128xf32, #tpu.memory_space<vmem>>) attributes {dimension_semantics = [], scalar_prefetch = 0 : i64, scratch_operands = 0 : i64, tpu.core_type = #tpu.core_type<tc>} {
    %c0 = arith.constant 0 : index
    %c0_0 = arith.constant 0 : index
    %0 = vector.load %arg1[%c0, %c0_0] : memref<8x8xf32, #tpu.memory_space<vmem>>, vector<8x8xf32>
    %c0_1 = arith.constant 0 : index
    %c0_2 = arith.constant 0 : index
    %1 = vector.load %arg2[%c0_1, %c0_2] : memref<8x8xf32, #tpu.memory_space<vmem>>, vector<8x8xf32>
    %c0_3 = arith.constant 0 : index
    %c0_4 = arith.constant 0 : index
    %2 = vector.load %arg3[%c0_3, %c0_4] : memref<128x128xf32, #tpu.memory_space<vmem>>, vector<128x128xf32>
    %c0_5 = arith.constant 0 : index
    %c0_6 = arith.constant 0 : index
    %3 = vector.load %arg4[%c0_5, %c0_6] : memref<1x128xf32, #tpu.memory_space<vmem>>, vector<1x128xf32>
    %c0_7 = arith.constant 0 : index
    %c0_8 = arith.constant 0 : index
    %4 = vector.load %arg5[%c0_7, %c0_8] : memref<128x128xf32, #tpu.memory_space<vmem>>, vector<128x128xf32>
    %c0_9 = arith.constant 0 : index
    %c0_10 = arith.constant 0 : index
    %5 = vector.load %arg6[%c0_9, %c0_10] : memref<1x128xf32, #tpu.memory_space<vmem>>, vector<1x128xf32>
    %c0_11 = arith.constant 0 : index
    %c0_12 = arith.constant 0 : index
    %6 = vector.load %arg7[%c0_11, %c0_12] : memref<128x128xf32, #tpu.memory_space<vmem>>, vector<128x128xf32>
    %c0_13 = arith.constant 0 : index
    %c0_14 = arith.constant 0 : index
    %7 = vector.load %arg8[%c0_13, %c0_14] : memref<128x128xf32, #tpu.memory_space<vmem>>, vector<128x128xf32>
    %c0_15 = arith.constant 0 : index
    %c0_16 = arith.constant 0 : index
    %8 = vector.load %arg9[%c0_15, %c0_16] : memref<128x128xf32, #tpu.memory_space<vmem>>, vector<128x128xf32>
    %c0_17 = arith.constant 0 : index
    %c0_18 = arith.constant 0 : index
    %9 = vector.load %arg10[%c0_17, %c0_18] : memref<128x128xf32, #tpu.memory_space<vmem>>, vector<128x128xf32>
    %c0_19 = arith.constant 0 : index
    %c0_20 = arith.constant 0 : index
    %10 = vector.load %arg11[%c0_19, %c0_20] : memref<128x128xf32, #tpu.memory_space<vmem>>, vector<128x128xf32>
    %c0_21 = arith.constant 0 : index
    %c0_22 = arith.constant 0 : index
    %11 = vector.load %arg12[%c0_21, %c0_22] : memref<128x128xf32, #tpu.memory_space<vmem>>, vector<128x128xf32>
    %c0_23 = arith.constant 0 : index
    %c0_24 = arith.constant 0 : index
    %12 = vector.load %arg13[%c0_23, %c0_24] : memref<128x128xf32, #tpu.memory_space<vmem>>, vector<128x128xf32>
    %c0_25 = arith.constant 0 : index
    %c0_26 = arith.constant 0 : index
    %13 = vector.load %arg14[%c0_25, %c0_26] : memref<128x128xf32, #tpu.memory_space<vmem>>, vector<128x128xf32>
    %c0_27 = arith.constant 0 : index
    %c0_28 = arith.constant 0 : index
    %14 = vector.load %arg15[%c0_27, %c0_28] : memref<128x128xf32, #tpu.memory_space<vmem>>, vector<128x128xf32>
    %c0_29 = arith.constant 0 : index
    %c0_30 = arith.constant 0 : index
    %15 = vector.load %arg16[%c0_29, %c0_30] : memref<1x128xf32, #tpu.memory_space<vmem>>, vector<1x128xf32>
    %c0_31 = arith.constant 0 : index
    %c0_32 = arith.constant 0 : index
    %16 = vector.load %arg17[%c0_31, %c0_32] : memref<1x128xf32, #tpu.memory_space<vmem>>, vector<1x128xf32>
    %c0_33 = arith.constant 0 : index
    %c0_34 = arith.constant 0 : index
    %17 = vector.load %arg18[%c0_33, %c0_34] : memref<1x128xf32, #tpu.memory_space<vmem>>, vector<1x128xf32>
    %c0_35 = arith.constant 0 : index
    %c0_36 = arith.constant 0 : index
    %18 = vector.load %arg19[%c0_35, %c0_36] : memref<1x128xf32, #tpu.memory_space<vmem>>, vector<1x128xf32>
    %c0_37 = arith.constant 0 : index
    %c0_38 = arith.constant 0 : index
    %19 = vector.load %arg0[%c0_37, %c0_38] : memref<8x128xf32, #tpu.memory_space<vmem>>, vector<8x128xf32>
    %c0_i32 = arith.constant 0 : i32
    %cst = arith.constant dense<0.000000e+00> : vector<8x128xf32>
    %20 = tpu.matmul %19, %2, %cst {dimension_numbers = #tpu.dot_dimension_numbers<[1], [0], [0], [1], [0, 0, 1, 1], [], []>} : vector<8x128xf32>, vector<128x128xf32>, vector<8x128xf32> -> vector<8x128xf32>
    %21 = vector.broadcast %3 : vector<1x128xf32> to vector<8x128xf32>
    %22 = arith.addf %20, %21 : vector<8x128xf32>
    %cst_39 = arith.constant dense<0.000000e+00> : vector<8x128xf32>
    %23 = tpu.matmul %19, %4, %cst_39 {dimension_numbers = #tpu.dot_dimension_numbers<[1], [0], [0], [1], [0, 0, 1, 1], [], []>} : vector<8x128xf32>, vector<128x128xf32>, vector<8x128xf32> -> vector<8x128xf32>
    %24 = vector.broadcast %5 : vector<1x128xf32> to vector<8x128xf32>
    %25 = arith.addf %23, %24 : vector<8x128xf32>
    %cst_40 = arith.constant dense<0.000000e+00> : vector<8x128xf32>
    %26 = tpu.matmul %0, %22, %cst_40 {dimension_numbers = #tpu.dot_dimension_numbers<[1], [0], [0], [1], [0, 0, 1, 1], [], []>} : vector<8x8xf32>, vector<8x128xf32>, vector<8x128xf32> -> vector<8x128xf32>
    %cst_41 = arith.constant dense<0.000000e+00> : vector<8x128xf32>
    %27 = tpu.matmul %1, %25, %cst_41 {dimension_numbers = #tpu.dot_dimension_numbers<[1], [0], [0], [1], [0, 0, 1, 1], [], []>} : vector<8x8xf32>, vector<8x128xf32>, vector<8x128xf32> -> vector<8x128xf32>
    %cst_42 = arith.constant dense<0.000000e+00> : vector<8x128xf32>
    %28 = tpu.matmul %26, %6, %cst_42 {dimension_numbers = #tpu.dot_dimension_numbers<[1], [0], [0], [1], [0, 0, 1, 1], [], []>} : vector<8x128xf32>, vector<128x128xf32>, vector<8x128xf32> -> vector<8x128xf32>
    %cst_43 = arith.constant dense<0.000000e+00> : vector<8x128xf32>
    %29 = tpu.matmul %27, %7, %cst_43 {dimension_numbers = #tpu.dot_dimension_numbers<[1], [0], [0], [1], [0, 0, 1, 1], [], []>} : vector<8x128xf32>, vector<128x128xf32>, vector<8x128xf32> -> vector<8x128xf32>
    %30 = arith.addf %28, %29 : vector<8x128xf32>
    %cst_44 = arith.constant dense<0.000000e+00> : vector<8x128xf32>
    %31 = tpu.matmul %19, %12, %cst_44 {dimension_numbers = #tpu.dot_dimension_numbers<[1], [0], [0], [1], [0, 0, 1, 1], [], []>} : vector<8x128xf32>, vector<128x128xf32>, vector<8x128xf32> -> vector<8x128xf32>
    %32 = arith.addf %30, %31 : vector<8x128xf32>
    %33 = vector.broadcast %15 : vector<1x128xf32> to vector<8x128xf32>
    %34 = arith.addf %32, %33 : vector<8x128xf32>
    %35 = arith.negf %34 : vector<8x128xf32>
    %36 = math.exp %35 : vector<8x128xf32>
    %cst_45 = arith.constant 1.000000e+00 : f32
    %37 = vector.broadcast %cst_45 : f32 to vector<8x128xf32>
    %38 = arith.addf %37, %36 : vector<8x128xf32>
    %39 = arith.divf %37, %38 : vector<8x128xf32>
    %cst_46 = arith.constant dense<0.000000e+00> : vector<8x128xf32>
    %40 = tpu.matmul %26, %8, %cst_46 {dimension_numbers = #tpu.dot_dimension_numbers<[1], [0], [0], [1], [0, 0, 1, 1], [], []>} : vector<8x128xf32>, vector<128x128xf32>, vector<8x128xf32> -> vector<8x128xf32>
    %cst_47 = arith.constant dense<0.000000e+00> : vector<8x128xf32>
    %41 = tpu.matmul %27, %9, %cst_47 {dimension_numbers = #tpu.dot_dimension_numbers<[1], [0], [0], [1], [0, 0, 1, 1], [], []>} : vector<8x128xf32>, vector<128x128xf32>, vector<8x128xf32> -> vector<8x128xf32>
    %42 = arith.addf %40, %41 : vector<8x128xf32>
    %cst_48 = arith.constant dense<0.000000e+00> : vector<8x128xf32>
    %43 = tpu.matmul %19, %13, %cst_48 {dimension_numbers = #tpu.dot_dimension_numbers<[1], [0], [0], [1], [0, 0, 1, 1], [], []>} : vector<8x128xf32>, vector<128x128xf32>, vector<8x128xf32> -> vector<8x128xf32>
    %44 = arith.addf %42, %43 : vector<8x128xf32>
    %45 = vector.broadcast %16 : vector<1x128xf32> to vector<8x128xf32>
    %46 = arith.addf %44, %45 : vector<8x128xf32>
    %47 = arith.negf %46 : vector<8x128xf32>
    %48 = math.exp %47 : vector<8x128xf32>
    %cst_49 = arith.constant 1.000000e+00 : f32
    %49 = vector.broadcast %cst_49 : f32 to vector<8x128xf32>
    %50 = arith.addf %49, %48 : vector<8x128xf32>
    %51 = arith.divf %49, %50 : vector<8x128xf32>
    %cst_50 = arith.constant dense<0.000000e+00> : vector<8x128xf32>
    %52 = tpu.matmul %26, %10, %cst_50 {dimension_numbers = #tpu.dot_dimension_numbers<[1], [0], [0], [1], [0, 0, 1, 1], [], []>} : vector<8x128xf32>, vector<128x128xf32>, vector<8x128xf32> -> vector<8x128xf32>
    %cst_51 = arith.constant dense<0.000000e+00> : vector<8x128xf32>
    %53 = tpu.matmul %27, %11, %cst_51 {dimension_numbers = #tpu.dot_dimension_numbers<[1], [0], [0], [1], [0, 0, 1, 1], [], []>} : vector<8x128xf32>, vector<128x128xf32>, vector<8x128xf32> -> vector<8x128xf32>
    %54 = arith.addf %52, %53 : vector<8x128xf32>
    %55 = vector.broadcast %17 : vector<1x128xf32> to vector<8x128xf32>
    %56 = arith.addf %54, %55 : vector<8x128xf32>
    %cst_52 = arith.constant dense<0.000000e+00> : vector<8x128xf32>
    %57 = tpu.matmul %19, %14, %cst_52 {dimension_numbers = #tpu.dot_dimension_numbers<[1], [0], [0], [1], [0, 0, 1, 1], [], []>} : vector<8x128xf32>, vector<128x128xf32>, vector<8x128xf32> -> vector<8x128xf32>
    %58 = vector.broadcast %18 : vector<1x128xf32> to vector<8x128xf32>
    %59 = arith.addf %57, %58 : vector<8x128xf32>
    %60 = arith.mulf %39, %59 : vector<8x128xf32>
    %61 = arith.addf %56, %60 : vector<8x128xf32>
    %62 = math.tanh %61 : vector<8x128xf32>
    %cst_53 = arith.constant 1.000000e+00 : f32
    %63 = vector.broadcast %cst_53 : f32 to vector<8x128xf32>
    %64 = arith.subf %63, %51 : vector<8x128xf32>
    %65 = arith.mulf %64, %62 : vector<8x128xf32>
    %66 = arith.mulf %51, %19 : vector<8x128xf32>
    %67 = arith.addf %65, %66 : vector<8x128xf32>
    %c0_54 = arith.constant 0 : index
    %c0_55 = arith.constant 0 : index
    %68 = vector.load %arg20[%c0_54, %c0_55] : memref<8x128xf32, #tpu.memory_space<vmem>>, vector<8x128xf32>
    tpu.vector_store %arg20[%c0_54, %c0_55], %67 {strides = array<i32>} : memref<8x128xf32, #tpu.memory_space<vmem>>, vector<8x128xf32>,
    return
  }
}

</mosaic_0001>

<bundles_post_ra>
// kernel: ggnn_forward.1
= control target key start
LH: loop header
LB: loop body
LE: loop exit
PB: predicated region body
PF: predicated region fallthrough
CT: control target
= control target key end

     0   :  { %s2951_s0 = inlined_call_operand.vmem [shape: f32[8,128], index: 0, kind: input, shape index: {}]   ;;  %s2952_s1 = inlined_call_operand.vmem [shape: f32[8,8], index: 1, kind: input, shape index: {}]   ;;  %s2953_s2 = inlined_call_operand.vmem [shape: f32[8,8], index: 2, kind: input, shape index: {}]   ;;  %s2954_s3 = inlined_call_operand.vmem [shape: f32[128,128], index: 3, kind: input, shape index: {}]   ;;  %s2955_s4 = inlined_call_operand.vmem [shape: f32[1,128], index: 4, kind: input, shape index: {}]   ;;  %s2956_s5 = inlined_call_operand.vmem [shape: f32[128,128], index: 5, kind: input, shape index: {}]   ;;  %s2957_s6 = inlined_call_operand.vmem [shape: f32[1,128], index: 6, kind: input, shape index: {}]   ;;  %s2958_s7 = inlined_call_operand.vmem [shape: f32[128,128], index: 7, kind: input, shape index: {}]   ;;  %s2959_s8 = inlined_call_operand.vmem [shape: f32[128,128], index: 8, kind: input, shape index: {}]   ;;  %s2960_s9 = inlined_call_operand.vmem [shape: f32[128,128], index: 9, kind: input, shape index: {}]   ;;  %s2961_s10 = inlined_call_operand.vmem [shape: f32[128,128], index: 10, kind: input, shape index: {}]   ;;  %s2962_s11 = inlined_call_operand.vmem [shape: f32[128,128], index: 11, kind: input, shape index: {}]   ;;  %s2963_s12 = inlined_call_operand.vmem [shape: f32[128,128], index: 12, kind: input, shape index: {}]   ;;  %s2964_s13 = inlined_call_operand.vmem [shape: f32[128,128], index: 13, kind: input, shape index: {}]   ;;  %s2965_s14 = inlined_call_operand.vmem [shape: f32[128,128], index: 14, kind: input, shape index: {}]   ;;  %s2966_s15 = inlined_call_operand.vmem [shape: f32[128,128], index: 15, kind: input, shape index: {}]   ;;  %s2967_s16 = inlined_call_operand.vmem [shape: f32[1,128], index: 16, kind: input, shape index: {}]   ;;  %s2968_s17 = inlined_call_operand.vmem [shape: f32[1,128], index: 17, kind: input, shape index: {}]   ;;  %s2969_s18 = inlined_call_operand.vmem [shape: f32[1,128], index: 18, kind: input, shape index: {}]   ;;  %s2970_s19 = inlined_call_operand.vmem [shape: f32[1,128], index: 19, kind: input, shape index: {}]   ;;  %s2971_s20 = inlined_call_operand.hbm [shape: f32[8,128], index: 20, kind: output, shape index: {}]  }
   0x1   :  { %2973 = sst [smem:[#allocation5_spill]] %s2951_s0 }
   0x2   :  { %2974 = sst [smem:[#allocation6_spill]] %s2952_s1 }
   0x3   :  { %2975 = sst [smem:[#allocation7_spill]] %s2953_s2 }
   0x4   :  { %2976 = sst [smem:[#allocation8_spill]] %s2954_s3 }
   0x5   :  { %2977 = sst [smem:[#allocation9_spill]] %s2955_s4 }
   0x6   :  { %s2978_s23 = sld [smem:[#allocation8_spill]]  ;;  %v85_v2 = vld [vmem:[%s2956_s5] sm:$0xff]  ;;  %v2141_v3 = vmov 0.0|0.0   ;;  %v86_v5 = vld [vmem:[%s2956_s5 + $0x8] sm:$0xff]  ;;  %v87_v9 = vld [vmem:[%s2956_s5 + $0x10] sm:$0xff]  ;;  %vm2142_vm0 = vmmov 0  }
   0x7   :  { %1839 = vmatprep.subr.bf16.mxu0 %v2141_v3  ;;  %1863 = vmatprep.subr.bf16.mxu1 %v2141_v3  ;;  %v1864_v8 = vpack.c.bf16 %v86_v5, %v85_v2  ;;  %v88_v10 = vld [vmem:[%s2956_s5 + $0x18] sm:$0xff]  ;;  %v2143_v11 = vmov 0.0   ;;  %v89_v16 = vld [vmem:[%s2956_s5 + $0x20] sm:$0xff]  ;;  %v90_v17 = vld [vmem:[%s2956_s5 + $0x28] sm:$0xff] }
   0x8   :  { %1476 = vmatprep.mubr.msk.f32.mxu0 %vm2142_vm0, %v2143_v11  ;;  %1511 = vmatprep.mubr.msk.f32.mxu1 %vm2142_vm0, %v2143_v11  ;;  %v1867_v13 = vpack.c.bf16 %v88_v10, %v87_v9  ;;  %v1870_v19 = vpack.c.bf16 %v90_v17, %v89_v16  ;;  %v91_v22 = vld [vmem:[%s2956_s5 + $0x30] sm:$0xff]  ;;  %v92_v23 = vld [vmem:[%s2956_s5 + $0x38] sm:$0xff] }
   0x9   :  { %1865 = vmatpush3.bf16.msra.mxu1 %v1864_v8 }
   0xa   :  { %1866 = vmatprep.subr.bf16.mxu1 %v2141_v3 }
   0xc   :  { %v68_v0 = vld [vmem:[%s2978_s23] sm:$0xff]  ;;  %v69_v1 = vld [vmem:[%s2978_s23 + $0x8] sm:$0xff]  ;;  %v70_v6 = vld [vmem:[%s2978_s23 + $0x10] sm:$0xff] }
   0xd   :  { %v1840_v4 = vpack.c.bf16 %v69_v1, %v68_v0  ;;  %v71_v7 = vld [vmem:[%s2978_s23 + $0x18] sm:$0xff]  ;;  %v72_v14 = vld [vmem:[%s2978_s23 + $0x20] sm:$0xff]  ;;  %v73_v15 = vld [vmem:[%s2978_s23 + $0x28] sm:$0xff]  ;;  %1868 = vmatpush3.bf16.msra.mxu1 %v1867_v13 }
   0xe   :  { %v1843_v12 = vpack.c.bf16 %v71_v7, %v70_v6  ;;  %v1846_v18 = vpack.c.bf16 %v73_v15, %v72_v14  ;;  %v74_v20 = vld [vmem:[%s2978_s23 + $0x30] sm:$0xff]  ;;  %v75_v21 = vld [vmem:[%s2978_s23 + $0x38] sm:$0xff]  ;;  %1869 = vmatprep.subr.bf16.mxu1 %v2141_v3 }
   0xf   :  { %1841 = vmatpush3.bf16.msra.mxu0 %v1840_v4  ;;  %v1849_v24 = vpack.c.bf16 %v75_v21, %v74_v20 }
  0x10   :  { %1842 = vmatprep.subr.bf16.mxu0 %v2141_v3 }
  0x13   :  { %1844 = vmatpush3.bf16.msra.mxu0 %v1843_v12 }
  0x14   :  { %1845 = vmatprep.subr.bf16.mxu0 %v2141_v3 }
  0x17   :  { %1847 = vmatpush3.bf16.msra.mxu0 %v1846_v18 }
  0x18   :  { %25 = vsyncpa [#allocation3], 0  ;;  %1848 = vmatprep.subr.bf16.mxu0 %v2141_v3  ;;  %1871 = vmatpush3.bf16.msra.mxu1 %v1870_v19  ;;  %v1873_v25 = vpack.c.bf16 %v92_v23, %v91_v22  ;;  %v76_v26 = vld [vmem:[%s2978_s23 + $0x40] sm:$0xff]  ;;  %v77_v27 = vld [vmem:[%s2978_s23 + $0x48] sm:$0xff]  ;;  %s2979_s4 = sld [smem:[#allocation5_spill]]  ;;  %s2980_s28 = sld [smem:[#allocation9_spill]] }
  0x19   :  { %1872 = vmatprep.subr.bf16.mxu1 %v2141_v3  ;;  %v93_v28 = vld [vmem:[%s2956_s5 + $0x40] sm:$0xff]  ;;  %v94_v29 = vld [vmem:[%s2956_s5 + $0x48] sm:$0xff]  ;;  %v1852_v30 = vpack.c.bf16 %v77_v27, %v76_v26  ;;  %v78_v32 = vld [vmem:[%s2978_s23 + $0x50] sm:$0xff]  ;;  %s2981_s0 = sld [smem:[#allocation6_spill]]  ;;  %vm403_vm1 = vcmask 64512   ;;  %s2982_s25 = sld [smem:[#allocation7_spill]] }
  0x1a   :  { %v1876_v31 = vpack.c.bf16 %v94_v29, %v93_v28  ;;  %v79_v33 = vld [vmem:[%s2978_s23 + $0x58] sm:$0xff]  ;;  %v95_v34 = vld [vmem:[%s2956_s5 + $0x50] sm:$0xff]  ;;  %v80_v38 = vld [vmem:[%s2978_s23 + $0x60] sm:$0xff] }
  0x1b   :  { %1850 = vmatpush3.bf16.msra.mxu0 %v1849_v24  ;;  %v96_v35 = vld [vmem:[%s2956_s5 + $0x58] sm:$0xff]  ;;  %v1855_v36 = vpack.c.bf16 %v79_v33, %v78_v32  ;;  %v81_v39 = vld [vmem:[%s2978_s23 + $0x68] sm:$0xff]  ;;  %v97_v40 = vld [vmem:[%s2956_s5 + $0x60] sm:$0xff] }
  0x1c   :  { %1851 = vmatprep.subr.bf16.mxu0 %v2141_v3  ;;  %1874 = vmatpush3.bf16.msra.mxu1 %v1873_v25  ;;  %v1879_v37 = vpack.c.bf16 %v96_v35, %v95_v34  ;;  %v98_v41 = vld [vmem:[%s2956_s5 + $0x68] sm:$0xff]  ;;  %v1858_v42 = vpack.c.bf16 %v81_v39, %v80_v38  ;;  %v82_v44 = vld [vmem:[%s2978_s23 + $0x70] sm:$0xff]  ;;  %v83_v45 = vld [vmem:[%s2978_s23 + $0x78] sm:$0xff] }
  0x1d   :  { %1875 = vmatprep.subr.bf16.mxu1 %v2141_v3  ;;  %v1882_v43 = vpack.c.bf16 %v98_v41, %v97_v40  ;;  %v99_v46 = vld [vmem:[%s2956_s5 + $0x70] sm:$0xff]  ;;  %v100_v47 = vld [vmem:[%s2956_s5 + $0x78] sm:$0xff]  ;;  %v1861_v48 = vpack.c.bf16 %v83_v45, %v82_v44  ;;  %v118_v51 = vld [vmem:[%s2959_s8] sm:$0xff] }
  0x1e   :  { %v1885_v49 = vpack.c.bf16 %v100_v47, %v99_v46  ;;  %v2369_v50 = vld [vmem:[%s2979_s4] sm:$0xff]  ;;  %v119_v52 = vld [vmem:[%s2959_s8 + $0x8] sm:$0xff]  ;;  %v120_v54 = vld [vmem:[%s2959_s8 + $0x10] sm:$0xff] }
  0x1f   :  { %1853 = vmatpush3.bf16.msra.mxu0 %v1852_v30  ;;  %v1888_v53 = vpack.c.bf16 %v119_v52, %v118_v51  ;;  %v121_v55 = vld [vmem:[%s2959_s8 + $0x18] sm:$0xff]  ;;  %v122_v57 = vld [vmem:[%s2959_s8 + $0x20] sm:$0xff]  ;;  %v123_v58 = vld [vmem:[%s2959_s8 + $0x28] sm:$0xff] }
  0x20   :  { %1854 = vmatprep.subr.bf16.mxu0 %v2141_v3  ;;  %1877 = vmatpush3.bf16.msra.mxu1 %v1876_v31  ;;  %v1891_v56 = vpack.c.bf16 %v121_v55, %v120_v54  ;;  %v1894_v59 = vpack.c.bf16 %v123_v58, %v122_v57  ;;  %v124_v60 = vld [vmem:[%s2959_s8 + $0x30] sm:$0xff]  ;;  %v125_v61 = vld [vmem:[%s2959_s8 + $0x38] sm:$0xff]  ;;  %v126_v63 = vld [vmem:[%s2959_s8 + $0x40] sm:$0xff] }
  0x21   :  { %1878 = vmatprep.subr.bf16.mxu1 %v2141_v3  ;;  %v1897_v62 = vpack.c.bf16 %v125_v61, %v124_v60  ;;  %v127_v0 = vld [vmem:[%s2959_s8 + $0x48] sm:$0xff]  ;;  %v128_v2 = vld [vmem:[%s2959_s8 + $0x50] sm:$0xff]  ;;  %v129_v4 = vld [vmem:[%s2959_s8 + $0x58] sm:$0xff] }
  0x22   :  { %v1900_v1 = vpack.c.bf16 %v127_v0, %v126_v63  ;;  %v1903_v5 = vpack.c.bf16 %v129_v4, %v128_v2  ;;  %v130_v6 = vld [vmem:[%s2959_s8 + $0x60] sm:$0xff]  ;;  %v131_v7 = vld [vmem:[%s2959_s8 + $0x68] sm:$0xff]  ;;  %v104_v23 = vld [vmem:[%s2958_s7 + $0x10] sm:$0xff] }
  0x23   :  { %1856 = vmatpush3.bf16.msra.mxu0 %v1855_v36  ;;  %v1906_v8 = vpack.c.bf16 %v131_v7, %v130_v6  ;;  %v1243_v9 = vld [vmem:[%s2980_s28] ss:$0 sm:$0xff]  ;;  %v103_v20 = vld [vmem:[%s2958_s7 + $0x8] sm:$0xff]  ;;  %v105_v24 = vld [vmem:[%s2958_s7 + $0x18] sm:$0xff] }
  0x24   :  { %1857 = vmatprep.subr.bf16.mxu0 %v2141_v3  ;;  %1880 = vmatpush3.bf16.msra.mxu1 %v1879_v37  ;;  %v1244_v10 = vld [vmem:[%s2957_s6] ss:$0 sm:$0xff]  ;;  %v1915_v25 = vpack.c.bf16 %v105_v24, %v104_v23  ;;  %v107_v27 = vld [vmem:[%s2958_s7 + $0x28] sm:$0xff]  ;;  %v108_v29 = vld [vmem:[%s2958_s7 + $0x30] sm:$0xff] }
  0x25   :  { %1881 = vmatprep.subr.bf16.mxu1 %v2141_v3  ;;  %v66_v16 = vld [vmem:[%s2981_s0] sm:$0xff]  ;;  %v109_v30 = vld [vmem:[%s2958_s7 + $0x38] sm:$0xff]  ;;  %v111_v33 = vld [vmem:[%s2958_s7 + $0x48] sm:$0xff] }
  0x26   :  { %v102_v19 = vld [vmem:[%s2958_s7] sm:$0xff]  ;;  %v1921_v31 = vpack.c.bf16 %v109_v30, %v108_v29  ;;  %v112_v35 = vld [vmem:[%s2958_s7 + $0x50] sm:$0xff]  ;;  %v113_v36 = vld [vmem:[%s2958_s7 + $0x58] sm:$0xff] }
  0x27   :  { %1859 = vmatpush3.bf16.msra.mxu0 %v1858_v42  ;;  %v67_v21 = vld [vmem:[%s2982_s25] sm:$0xff]  ;;  %v1912_v22 = vpack.c.bf16 %v103_v20, %v102_v19  ;;  %v1927_v37 = vpack.c.bf16 %v113_v36, %v112_v35  ;;  %v115_v39 = vld [vmem:[%s2958_s7 + $0x68] sm:$0xff]  ;;  %v116_v41 = vld [vmem:[%s2958_s7 + $0x70] sm:$0xff] }
  0x28   :  { %1860 = vmatprep.subr.bf16.mxu0 %v2141_v3  ;;  %1883 = vmatpush3.bf16.msra.mxu1 %v1882_v43  ;;  %v106_v26 = vld [vmem:[%s2958_s7 + $0x20] sm:$0xff]  ;;  %v117_v42 = vld [vmem:[%s2958_s7 + $0x78] sm:$0xff]  ;;  %v132_v44 = vld [vmem:[%s2959_s8 + $0x70] sm:$0xff] }
  0x29   :  { %1884 = vmatprep.subr.bf16.mxu1 %v2141_v3  ;;  %v1918_v28 = vpack.c.bf16 %v107_v27, %v106_v26  ;;  %v110_v32 = vld [vmem:[%s2958_s7 + $0x40] sm:$0xff]  ;;  %v1933_v43 = vpack.c.bf16 %v117_v42, %v116_v41  ;;  %v133_v45 = vld [vmem:[%s2959_s8 + $0x78] sm:$0xff]  ;;  %v199_v52 = vld [vmem:[%s2964_s13 + $0x8] sm:$0xff] }
  0x2a   :  { %v1924_v34 = vpack.c.bf16 %v111_v33, %v110_v32  ;;  %v114_v38 = vld [vmem:[%s2958_s7 + $0x60] sm:$0xff]  ;;  %v1909_v46 = vpack.c.bf16 %v133_v45, %v132_v44  ;;  %v153_v54 = vld [vmem:[%s2961_s10 + $0x18] sm:$0xff]  ;;  %v156_v6 = vld [vmem:[%s2961_s10 + $0x30] sm:$0xff] }
  0x2b   :  { %1862 = vmatpush3.bf16.msra.mxu0 %v1861_v48  ;;  %v1930_v40 = vpack.c.bf16 %v115_v39, %v114_v38  ;;  %v150_v47 = vld [vmem:[%s2961_s10] sm:$0xff]  ;;  %v151_v48 = vld [vmem:[%s2961_s10 + $0x8] sm:$0xff]  ;;  %v201_v60 = vld [vmem:[%s2964_s13 + $0x18] sm:$0xff] }
  0x2c   :  { %1886 = vmatpush3.bf16.msra.mxu1 %v1885_v49  ;;  %1887 = vmatprep.subr.bf16.mxu0 %v2141_v3  ;;  %v1960_v49 = vpack.c.bf16 %v151_v48, %v150_v47  ;;  %v198_v51 = vld [vmem:[%s2964_s13] sm:$0xff]  ;;  %v157_v7 = vld [vmem:[%s2961_s10 + $0x38] sm:$0xff]  ;;  %v160_v19 = vld [vmem:[%s2961_s10 + $0x50] sm:$0xff] }
  0x2d   :  { %1514 = vmatprep.subr.mxu1 %v2143_v11  ;;  %v1936_v57 = vpack.c.bf16 %v199_v52, %v198_v51  ;;  %v154_v61 = vld [vmem:[%s2961_s10 + $0x20] sm:$0xff]  ;;  %v161_v20 = vld [vmem:[%s2961_s10 + $0x58] sm:$0xff]  ;;  %v208_v23 = vld [vmem:[%s2964_s13 + $0x50] sm:$0xff] }
  0x2e   :  { %1477 = vmatmul.mubr.f32.vlgmr.msra.gmra.mrb[0].mxu0 %v2369_v50  ;;  %v202_v4 = vld [vmem:[%s2964_s13 + $0x20] sm:$0xff]  ;;  %v209_v24 = vld [vmem:[%s2964_s13 + $0x58] sm:$0xff]  ;;  %v163_v26 = vld [vmem:[%s2961_s10 + $0x68] sm:$0xff] }
  0x2f   :  { %1512 = vmatmul.mubr.f32.vlgmr.msra.gmra.mrb[0].mxu1 %v2369_v50  ;;  %1556 = vmatprep.mubr.msk.f32.mxu0 %vm2142_vm0, %v2143_v11  ;;  %v1951_v27 = vpack.c.bf16 %v209_v24, %v208_v23  ;;  %v210_v29 = vld [vmem:[%s2964_s13 + $0x60] sm:$0xff]  ;;  %v211_v30 = vld [vmem:[%s2964_s13 + $0x68] sm:$0xff]  ;;  %v165_v32 = vld [vmem:[%s2961_s10 + $0x78] sm:$0xff] }
  0x30   :  { %1516 = vmatprep.mubr.msk.f32.mxu1 %vm2142_vm0, %v2143_v11  ;;  %1889 = vmatpush3.bf16.msra.mxu0 %v1888_v53  ;;  %v152_v53 = vld [vmem:[%s2961_s10 + $0x10] sm:$0xff]  ;;  %v1954_v33 = vpack.c.bf16 %v211_v30, %v210_v29  ;;  %v213_v36 = vld [vmem:[%s2964_s13 + $0x78] sm:$0xff]  ;;  %v215_v38 = vld [vmem:[%s2965_s14 + $0x8] sm:$0xff] }
  0x31   :  { %1890 = vmatprep.subr.bf16.mxu0 %v2141_v3  ;;  %v1963_v58 = vpack.c.bf16 %v153_v54, %v152_v53  ;;  %v212_v35 = vld [vmem:[%s2964_s13 + $0x70] sm:$0xff]  ;;  %v134_v41 = vld [vmem:[%s2960_s9] sm:$0xff]  ;;  %v135_v42 = vld [vmem:[%s2960_s9 + $0x8] sm:$0xff] }
  0x32   :  { %v1957_v39 = vpack.c.bf16 %v213_v36, %v212_v35  ;;  %v217_v44 = vld [vmem:[%s2965_s14 + $0x18] sm:$0xff]  ;;  %v1984_v45 = vpack.c.bf16 %v135_v42, %v134_v41  ;;  %v136_v47 = vld [vmem:[%s2960_s9 + $0x10] sm:$0xff]  ;;  %v219_v51 = vld [vmem:[%s2965_s14 + $0x28] sm:$0xff] }
  0x33   :  { %v137_v48 = vld [vmem:[%s2960_s9 + $0x18] sm:$0xff]  ;;  %v138_v54 = vld [vmem:[%s2960_s9 + $0x20] sm:$0xff]  ;;  %v148_v24 = vld [vmem:[%s2960_s9 + $0x70] sm:$0xff] }
  0x34   :  { %1892 = vmatpush3.bf16.msra.mxu0 %v1891_v56  ;;  %v1987_v52 = vpack.c.bf16 %v137_v48, %v136_v47  ;;  %v182_v30 = vld [vmem:[%s2963_s12] sm:$0xff]  ;;  %v184_v36 = vld [vmem:[%s2963_s12 + $0x10] sm:$0xff] }
  0x35   :  { %1893 = vmatprep.subr.bf16.mxu0 %v2141_v3  ;;  %v186_v42 = vld [vmem:[%s2963_s12 + $0x20] sm:$0xff]  ;;  %v188_v48 = vld [vmem:[%s2963_s12 + $0x30] sm:$0xff] }
  0x38   :  { %1895 = vmatpush3.bf16.msra.mxu0 %v1894_v59  ;;  %v200_v59 = vld [vmem:[%s2964_s13 + $0x10] sm:$0xff] }
  0x39   :  { %1896 = vmatprep.subr.bf16.mxu0 %v2141_v3 }
  0x3c   :  { %1898 = vmatpush3.bf16.msra.mxu0 %v1897_v62  ;;  %v155_v62 = vld [vmem:[%s2961_s10 + $0x28] sm:$0xff] }
  0x3d   :  { %1899 = vmatprep.subr.bf16.mxu0 %v2141_v3  ;;  %v1966_v2 = vpack.c.bf16 %v155_v62, %v154_v61  ;;  %v140_v61 = vld [vmem:[%s2960_s9 + $0x30] sm:$0xff]  ;;  %v141_v62 = vld [vmem:[%s2960_s9 + $0x38] sm:$0xff] }
  0x40   :  { %1901 = vmatpush3.bf16.msra.mxu0 %v1900_v1  ;;  %v1939_v1 = vpack.c.bf16 %v201_v60, %v200_v59 }
  0x41   :  { %1902 = vmatprep.subr.bf16.mxu0 %v2141_v3 }
  0x44   :  { %1904 = vmatpush3.bf16.msra.mxu0 %v1903_v5  ;;  %v203_v5 = vld [vmem:[%s2964_s13 + $0x28] sm:$0xff] }
  0x45   :  { %1905 = vmatprep.subr.bf16.mxu0 %v2141_v3 }
  0x48   :  { %1907 = vmatpush3.bf16.msra.mxu0 %v1906_v8  ;;  %v1942_v8 = vpack.c.bf16 %v203_v5, %v202_v4  ;;  %v142_v5 = vld [vmem:[%s2960_s9 + $0x40] sm:$0xff] }
  0x49   :  { %1908 = vmatprep.subr.bf16.mxu0 %v2141_v3 }
  0x4c   :  { %1910 = vmatpush3.bf16.msra.mxu0 %v1909_v46 }
  0x4d   :  { %1935 = vmatprep.subr.bf16.mxu0 %v2141_v3 }
 0x101   :  { %v323_v12 = vpop.f32.mrb[0].mxu0 }
 0x102   :  { %v324_v13 = vadd.f32 %v1243_v9, %v323_v12  ;;  %v1478_v14 = vpop.f32.mrb[1].mxu0  ;;  %v399_v15 = vpop.f32.mrb[0].mxu1  ;;  %v1969_v9 = vpack.c.bf16 %v157_v7, %v156_v6  ;;  %v205_v12 = vld [vmem:[%s2964_s13 + $0x38] sm:$0xff]  ;;  %v143_v6 = vld [vmem:[%s2960_s9 + $0x48] sm:$0xff]  ;;  %v224_v7 = vld [vmem:[%s2965_s14 + $0x50] sm:$0xff] }
 0x103   :  { %v400_v17 = vadd.f32 %v1244_v10, %v399_v15  ;;  %v1513_v18 = vpop.f32.mrb[1].mxu1  ;;  %v204_v10 = vld [vmem:[%s2964_s13 + $0x30] sm:$0xff]  ;;  %v159_v14 = vld [vmem:[%s2961_s10 + $0x48] sm:$0xff] }
 0x104   :  { %1515 = vmatpush3.msra.mxu1 %v324_v13  ;;  %v158_v13 = vld [vmem:[%s2961_s10 + $0x40] sm:$0xff]  ;;  %v1945_v15 = vpack.c.bf16 %v205_v12, %v204_v10  ;;  %v207_v18 = vld [vmem:[%s2964_s13 + $0x48] sm:$0xff]  ;;  %v144_v12 = vld [vmem:[%s2960_s9 + $0x50] sm:$0xff] }
 0x105   :  { %1517 = vmatmul.mubr.msk.f32.vlgmr.msra.gmra.mrb[2].mxu1 %vm403_vm1, %v66_v16  ;;  %1519 = vmatprep.subr.mxu1 %v2143_v11  ;;  %v1972_v16 = vpack.c.bf16 %v159_v14, %v158_v13  ;;  %v145_v13 = vld [vmem:[%s2960_s9 + $0x58] sm:$0xff]  ;;  %v226_v14 = vld [vmem:[%s2965_s14 + $0x60] sm:$0xff] }
 0x106   :  { %1520 = vmatpush3.msra.mxu1 %v400_v17  ;;  %1521 = vmatprep.mubr.msk.f32.mxu1 %vm2142_vm0, %v2143_v11  ;;  %v206_v17 = vld [vmem:[%s2964_s13 + $0x40] sm:$0xff] }
 0x107   :  { %1911 = vmatprep.subr.bf16.mxu1 %v2141_v3 }
 0x109   :  { %1522 = vmatmul.mubr.msk.f32.vlgmr.msra.gmra.mrb[4].mxu1 %vm403_vm1, %v67_v21  ;;  %v1948_v21 = vpack.c.bf16 %v207_v18, %v206_v17  ;;  %v146_v18 = vld [vmem:[%s2960_s9 + $0x60] sm:$0xff] }
 0x10a   :  { %1913 = vmatpush3.bf16.msra.mxu1 %v1912_v22  ;;  %1591 = vmatprep.mubr.msk.f32.mxu1 %vm2142_vm0, %v2143_v11  ;;  %v1975_v22 = vpack.c.bf16 %v161_v20, %v160_v19  ;;  %v147_v19 = vld [vmem:[%s2960_s9 + $0x68] sm:$0xff]  ;;  %v228_v20 = vld [vmem:[%s2965_s14 + $0x70] sm:$0xff] }
 0x10b   :  { %1914 = vmatprep.subr.bf16.mxu1 %v2141_v3 }
 0x10e   :  { %1916 = vmatpush3.bf16.msra.mxu1 %v1915_v25  ;;  %v162_v25 = vld [vmem:[%s2961_s10 + $0x60] sm:$0xff] }
 0x10f   :  { %1917 = vmatprep.subr.bf16.mxu1 %v2141_v3 }
 0x112   :  { %1919 = vmatpush3.bf16.msra.mxu1 %v1918_v28  ;;  %v1978_v28 = vpack.c.bf16 %v163_v26, %v162_v25  ;;  %v149_v25 = vld [vmem:[%s2960_s9 + $0x78] sm:$0xff]  ;;  %v166_v26 = vld [vmem:[%s2962_s11] sm:$0xff] }
 0x113   :  { %1920 = vmatprep.subr.bf16.mxu1 %v2141_v3 }
 0x116   :  { %1922 = vmatpush3.bf16.msra.mxu1 %v1921_v31  ;;  %v164_v31 = vld [vmem:[%s2961_s10 + $0x70] sm:$0xff] }
 0x117   :  { %1923 = vmatprep.subr.bf16.mxu1 %v2141_v3 }
 0x11a   :  { %1925 = vmatpush3.bf16.msra.mxu1 %v1924_v34  ;;  %v1981_v34 = vpack.c.bf16 %v165_v32, %v164_v31  ;;  %v183_v31 = vld [vmem:[%s2963_s12 + $0x8] sm:$0xff]  ;;  %v168_v32 = vld [vmem:[%s2962_s11 + $0x10] sm:$0xff] }
 0x11b   :  { %1926 = vmatprep.subr.bf16.mxu1 %v2141_v3 }
 0x11e   :  { %1928 = vmatpush3.bf16.msra.mxu1 %v1927_v37  ;;  %v214_v37 = vld [vmem:[%s2965_s14] sm:$0xff] }
 0x11f   :  { %1929 = vmatprep.subr.bf16.mxu1 %v2141_v3 }
 0x122   :  { %1931 = vmatpush3.bf16.msra.mxu1 %v1930_v40  ;;  %v2008_v40 = vpack.c.bf16 %v215_v38, %v214_v37  ;;  %v185_v37 = vld [vmem:[%s2963_s12 + $0x18] sm:$0xff]  ;;  %v170_v38 = vld [vmem:[%s2962_s11 + $0x20] sm:$0xff] }
 0x123   :  { %1932 = vmatprep.subr.bf16.mxu1 %v2141_v3 }
 0x126   :  { %1934 = vmatpush3.bf16.msra.mxu1 %v1933_v43  ;;  %v216_v43 = vld [vmem:[%s2965_s14 + $0x10] sm:$0xff] }
 0x127   :  { %1959 = vmatprep.subr.bf16.mxu1 %v2141_v3  ;;  %v2011_v46 = vpack.c.bf16 %v217_v44, %v216_v43  ;;  %v187_v43 = vld [vmem:[%s2963_s12 + $0x28] sm:$0xff]  ;;  %v172_v44 = vld [vmem:[%s2962_s11 + $0x30] sm:$0xff] }
 0x1d8   :  { %v2527_v55 = vpop.f32.mrb[2].mxu1 }
 0x1d9   :  { %1592 = vmatmul.mubr.f32.vlgmr.msra.gmra.mrb[6].mxu1 %v2527_v55  ;;  %v1518_v56 = vpop.f32.mrb[3].mxu1 }
 0x1da   :  { %1961 = vmatpush3.bf16.msra.mxu1 %v1960_v49  ;;  %1661 = vmatprep.mubr.msk.f32.mxu1 %vm2142_vm0, %v2143_v11  ;;  %v218_v49 = vld [vmem:[%s2965_s14 + $0x20] sm:$0xff]  ;;  %v139_v56 = vld [vmem:[%s2960_s9 + $0x28] sm:$0xff] }
 0x1db   :  { %1962 = vmatprep.subr.bf16.mxu1 %v2141_v3  ;;  %v2014_v53 = vpack.c.bf16 %v219_v51, %v218_v49  ;;  %v1990_v59 = vpack.c.bf16 %v139_v56, %v138_v54  ;;  %v189_v49 = vld [vmem:[%s2963_s12 + $0x38] sm:$0xff]  ;;  %v174_v51 = vld [vmem:[%s2962_s11 + $0x40] sm:$0xff] }
 0x1dc   :  { %v2545_v63 = vpop.f32.mrb[4].mxu1  ;;  %v190_v56 = vld [vmem:[%s2963_s12 + $0x40] sm:$0xff] }
 0x1dd   :  { %1557 = vmatmul.mubr.f32.vlgmr.msra.gmra.mrb[2].mxu0 %v2545_v63  ;;  %v1523_v0 = vpop.f32.mrb[5].mxu1 }
 0x1de   :  { %1937 = vmatpush3.bf16.msra.mxu0 %v1936_v57  ;;  %1964 = vmatpush3.bf16.msra.mxu1 %v1963_v58  ;;  %v220_v57 = vld [vmem:[%s2965_s14 + $0x30] sm:$0xff]  ;;  %v221_v58 = vld [vmem:[%s2965_s14 + $0x38] sm:$0xff]  ;;  %v222_v0 = vld [vmem:[%s2965_s14 + $0x40] sm:$0xff] }
 0x1df   :  { %1938 = vmatprep.subr.bf16.mxu0 %v2141_v3  ;;  %1965 = vmatprep.subr.bf16.mxu1 %v2141_v3  ;;  %v2017_v60 = vpack.c.bf16 %v221_v58, %v220_v57  ;;  %v191_v57 = vld [vmem:[%s2963_s12 + $0x48] sm:$0xff]  ;;  %v176_v58 = vld [vmem:[%s2962_s11 + $0x50] sm:$0xff] }
 0x1e0   :  { %1626 = vmatprep.mubr.msk.f32.mxu0 %vm2142_vm0, %v2143_v11 }
 0x1e2   :  { %1940 = vmatpush3.bf16.msra.mxu0 %v1939_v1  ;;  %1967 = vmatpush3.bf16.msra.mxu1 %v1966_v2  ;;  %v223_v1 = vld [vmem:[%s2965_s14 + $0x48] sm:$0xff]  ;;  %v1993_v2 = vpack.c.bf16 %v141_v62, %v140_v61  ;;  %v192_v62 = vld [vmem:[%s2963_s12 + $0x50] sm:$0xff] }
 0x1e3   :  { %1941 = vmatprep.subr.bf16.mxu0 %v2141_v3  ;;  %1968 = vmatprep.subr.bf16.mxu1 %v2141_v3  ;;  %v2020_v4 = vpack.c.bf16 %v223_v1, %v222_v0  ;;  %v193_v0 = vld [vmem:[%s2963_s12 + $0x58] sm:$0xff]  ;;  %v178_v1 = vld [vmem:[%s2962_s11 + $0x60] sm:$0xff] }
 0x1e6   :  { %1943 = vmatpush3.bf16.msra.mxu0 %v1942_v8  ;;  %1970 = vmatpush3.bf16.msra.mxu1 %v1969_v9  ;;  %v225_v8 = vld [vmem:[%s2965_s14 + $0x58] sm:$0xff]  ;;  %v1996_v9 = vpack.c.bf16 %v143_v6, %v142_v5  ;;  %v194_v6 = vld [vmem:[%s2963_s12 + $0x60] sm:$0xff] }
 0x1e7   :  { %1944 = vmatprep.subr.bf16.mxu0 %v2141_v3  ;;  %1971 = vmatprep.subr.bf16.mxu1 %v2141_v3  ;;  %v2023_v10 = vpack.c.bf16 %v225_v8, %v224_v7  ;;  %v195_v7 = vld [vmem:[%s2963_s12 + $0x68] sm:$0xff]  ;;  %v180_v8 = vld [vmem:[%s2962_s11 + $0x70] sm:$0xff] }
 0x1ea   :  { %1946 = vmatpush3.bf16.msra.mxu0 %v1945_v15  ;;  %1973 = vmatpush3.bf16.msra.mxu1 %v1972_v16  ;;  %v227_v15 = vld [vmem:[%s2965_s14 + $0x68] sm:$0xff]  ;;  %v1999_v16 = vpack.c.bf16 %v145_v13, %v144_v12  ;;  %v196_v13 = vld [vmem:[%s2963_s12 + $0x70] sm:$0xff] }
 0x1eb   :  { %1947 = vmatprep.subr.bf16.mxu0 %v2141_v3  ;;  %1974 = vmatprep.subr.bf16.mxu1 %v2141_v3  ;;  %v2026_v17 = vpack.c.bf16 %v227_v15, %v226_v14  ;;  %v197_v14 = vld [vmem:[%s2963_s12 + $0x78] sm:$0xff] }
 0x1ec   :  { %v2053_v15 = vpack.c.bf16 %v197_v14, %v196_v13 }
 0x1ee   :  { %1949 = vmatpush3.bf16.msra.mxu0 %v1948_v21  ;;  %1976 = vmatpush3.bf16.msra.mxu1 %v1975_v22  ;;  %v229_v21 = vld [vmem:[%s2965_s14 + $0x78] sm:$0xff]  ;;  %v2002_v22 = vpack.c.bf16 %v147_v19, %v146_v18  ;;  %v232_v19 = vld [vmem:[%s2966_s15 + $0x10] sm:$0xff] }
 0x1ef   :  { %1950 = vmatprep.subr.bf16.mxu0 %v2141_v3  ;;  %1977 = vmatprep.subr.bf16.mxu1 %v2141_v3  ;;  %v2029_v23 = vpack.c.bf16 %v229_v21, %v228_v20  ;;  %v233_v20 = vld [vmem:[%s2966_s15 + $0x18] sm:$0xff] }
 0x1f0   :  { %v2083_v21 = vpack.c.bf16 %v233_v20, %v232_v19 }
 0x1f2   :  { %1952 = vmatpush3.bf16.msra.mxu0 %v1951_v27  ;;  %1979 = vmatpush3.bf16.msra.mxu1 %v1978_v28  ;;  %v167_v27 = vld [vmem:[%s2962_s11 + $0x8] sm:$0xff]  ;;  %v2005_v28 = vpack.c.bf16 %v149_v25, %v148_v24  ;;  %v238_v25 = vld [vmem:[%s2966_s15 + $0x40] sm:$0xff] }
 0x1f3   :  { %1953 = vmatprep.subr.bf16.mxu0 %v2141_v3  ;;  %1980 = vmatprep.subr.bf16.mxu1 %v2141_v3  ;;  %v2056_v29 = vpack.c.bf16 %v167_v27, %v166_v26  ;;  %v239_v26 = vld [vmem:[%s2966_s15 + $0x48] sm:$0xff] }
 0x1f4   :  { %v2092_v27 = vpack.c.bf16 %v239_v26, %v238_v25 }
 0x1f6   :  { %1955 = vmatpush3.bf16.msra.mxu0 %v1954_v33  ;;  %1982 = vmatpush3.bf16.msra.mxu1 %v1981_v34  ;;  %v169_v33 = vld [vmem:[%s2962_s11 + $0x18] sm:$0xff]  ;;  %v2032_v34 = vpack.c.bf16 %v183_v31, %v182_v30  ;;  %v242_v31 = vld [vmem:[%s2966_s15 + $0x60] sm:$0xff] }
 0x1f7   :  { %1956 = vmatprep.subr.bf16.mxu0 %v2141_v3  ;;  %2007 = vmatprep.subr.bf16.mxu1 %v2141_v3  ;;  %v2059_v35 = vpack.c.bf16 %v169_v33, %v168_v32  ;;  %v243_v32 = vld [vmem:[%s2966_s15 + $0x68] sm:$0xff] }
 0x1f8   :  { %v2098_v33 = vpack.c.bf16 %v243_v32, %v242_v31 }
 0x1f9   :  { %1662 = vmatmul.mubr.f32.vlgmr.msra.gmra.mrb[8].mxu1 %v2545_v63 }
 0x1fa   :  { %1958 = vmatpush3.bf16.msra.mxu0 %v1957_v39  ;;  %2009 = vmatpush3.bf16.msra.mxu1 %v2008_v40  ;;  %v171_v39 = vld [vmem:[%s2962_s11 + $0x28] sm:$0xff]  ;;  %v2035_v40 = vpack.c.bf16 %v185_v37, %v184_v36 }
 0x1fb   :  { %1983 = vmatprep.subr.bf16.mxu0 %v2141_v3  ;;  %2010 = vmatprep.subr.bf16.mxu1 %v2141_v3  ;;  %v2062_v41 = vpack.c.bf16 %v171_v39, %v170_v38 }
 0x1fc   :  { %1731 = vmatprep.mubr.msk.f32.mxu1 %vm2142_vm0, %v2143_v11 }
 0x1fd   :  { %1627 = vmatmul.mubr.f32.vlgmr.msra.gmra.mrb[4].mxu0 %v2369_v50 }
 0x1fe   :  { %1985 = vmatpush3.bf16.msra.mxu0 %v1984_v45  ;;  %2012 = vmatpush3.bf16.msra.mxu1 %v2011_v46  ;;  %v173_v45 = vld [vmem:[%s2962_s11 + $0x38] sm:$0xff]  ;;  %v2038_v46 = vpack.c.bf16 %v187_v43, %v186_v42 }
 0x1ff   :  { %1986 = vmatprep.subr.bf16.mxu0 %v2141_v3  ;;  %2013 = vmatprep.subr.bf16.mxu1 %v2141_v3  ;;  %v2065_v47 = vpack.c.bf16 %v173_v45, %v172_v44 }
 0x200   :  { %1696 = vmatprep.mubr.msk.f32.mxu0 %vm2142_vm0, %v2143_v11 }
 0x202   :  { %1988 = vmatpush3.bf16.msra.mxu0 %v1987_v52  ;;  %2015 = vmatpush3.bf16.msra.mxu1 %v2014_v53  ;;  %v175_v52 = vld [vmem:[%s2962_s11 + $0x48] sm:$0xff]  ;;  %v2041_v53 = vpack.c.bf16 %v189_v49, %v188_v48 }
 0x203   :  { %1989 = vmatprep.subr.bf16.mxu0 %v2141_v3  ;;  %2016 = vmatprep.subr.bf16.mxu1 %v2141_v3  ;;  %v2068_v54 = vpack.c.bf16 %v175_v52, %v174_v51 }
 0x206   :  { %1991 = vmatpush3.bf16.msra.mxu0 %v1990_v59  ;;  %2018 = vmatpush3.bf16.msra.mxu1 %v2017_v60  ;;  %v177_v59 = vld [vmem:[%s2962_s11 + $0x58] sm:$0xff]  ;;  %v2044_v60 = vpack.c.bf16 %v191_v57, %v190_v56 }
 0x207   :  { %1992 = vmatprep.subr.bf16.mxu0 %v2141_v3  ;;  %2019 = vmatprep.subr.bf16.mxu1 %v2141_v3  ;;  %v2071_v61 = vpack.c.bf16 %v177_v59, %v176_v58 }
 0x20a   :  { %1994 = vmatpush3.bf16.msra.mxu0 %v1993_v2  ;;  %2021 = vmatpush3.bf16.msra.mxu1 %v2020_v4  ;;  %v179_v2 = vld [vmem:[%s2962_s11 + $0x68] sm:$0xff]  ;;  %v2047_v4 = vpack.c.bf16 %v193_v0, %v192_v62  ;;  %v1249_v62 = vld [vmem:[%s2968_s17] ss:$0 sm:$0xff]  ;;  %s2144_s17 = smov [#allocation2]  }
 0x20b   :  { %1995 = vmatprep.subr.bf16.mxu0 %v2141_v3  ;;  %2022 = vmatprep.subr.bf16.mxu1 %v2141_v3  ;;  %v2074_v5 = vpack.c.bf16 %v179_v2, %v178_v1  ;;  %s1235_s9 = sshll.u32 %s2144_s17, 4  ;;  %s1236_s9 = int_to_ptr.vmem [resolvable:$true] %s1235_s9 }
 0x20c   :  { %p2122_p1 = scmp.lt.s32.totalorder %s1236_s9, %s1236_s9 }
 0x20e   :  { %1997 = vmatpush3.bf16.msra.mxu0 %v1996_v9  ;;  %2024 = vmatpush3.bf16.msra.mxu1 %v2023_v10  ;;  %v181_v9 = vld [vmem:[%s2962_s11 + $0x78] sm:$0xff]  ;;  %v2050_v10 = vpack.c.bf16 %v195_v7, %v194_v6  ;;  %v1252_v6 = vld [vmem:[%s2970_s19] ss:$0 sm:$0xff] }
 0x20f   :  { %1998 = vmatprep.subr.bf16.mxu0 %v2141_v3  ;;  %2025 = vmatprep.subr.bf16.mxu1 %v2141_v3  ;;  %v2077_v12 = vpack.c.bf16 %v181_v9, %v180_v8  ;;  %v1251_v8 = vld [vmem:[%s2969_s18] ss:$0 sm:$0xff]  ;;  %s2117_s18 = scalar_lea.vmem %s1236_s9, 128 }
 0x210   :  { %p2118_p0 = scmp.ne.s32.totalorder %s1236_s9, %s2117_s18  ;;  %p2123_p2 = scmp.lt.s32.totalorder %s2117_s18, %s2117_s18 }
 0x212   :  { %2000 = vmatpush3.bf16.msra.mxu0 %v1999_v16  ;;  %2027 = vmatpush3.bf16.msra.mxu1 %v2026_v17  ;;  %v230_v16 = vld [vmem:[%s2966_s15] sm:$0xff]  ;;  %v231_v17 = vld [vmem:[%s2966_s15 + $0x8] sm:$0xff]  ;;  %p2124_p3 = por %p2123_p2, %p2122_p1 }
 0x213   :  { %2001 = vmatprep.subr.bf16.mxu0 %v2141_v3  ;;  %2028 = vmatprep.subr.bf16.mxu1 %v2141_v3  ;;  %v2080_v18 = vpack.c.bf16 %v231_v17, %v230_v16 }
 0x214   :  { %p2125_p4 = pnand %p2124_p3, %p2118_p0 }
 0x216   :  { %2003 = vmatpush3.bf16.msra.mxu0 %v2002_v22  ;;  %2030 = vmatpush3.bf16.msra.mxu1 %v2029_v23  ;;  %v235_v22 = vld [vmem:[%s2966_s15 + $0x28] sm:$0xff] }
 0x217   :  { %2004 = vmatprep.subr.bf16.mxu0 %v2141_v3  ;;  %2055 = vmatprep.subr.bf16.mxu1 %v2141_v3 }
 0x219   :  { %1732 = vmatmul.mubr.f32.vlgmr.msra.gmra.mrb[10].mxu1 %v2369_v50 }
 0x21a   :  { %2006 = vmatpush3.bf16.msra.mxu0 %v2005_v28  ;;  %2057 = vmatpush3.bf16.msra.mxu1 %v2056_v29  ;;  %v240_v28 = vld [vmem:[%s2966_s15 + $0x50] sm:$0xff]  ;;  %v241_v29 = vld [vmem:[%s2966_s15 + $0x58] sm:$0xff] }
 0x21b   :  { %2031 = vmatprep.subr.bf16.mxu0 %v2141_v3  ;;  %2058 = vmatprep.subr.bf16.mxu1 %v2141_v3  ;;  %v2095_v30 = vpack.c.bf16 %v241_v29, %v240_v28 }
 0x21c   :  { %1801 = vmatprep.mubr.msk.f32.mxu1 %vm2142_vm0, %v2143_v11 }
 0x21d   :  { %1697 = vmatmul.mubr.f32.vlgmr.msra.gmra.mrb[6].mxu0 %v2527_v55 }
 0x21e   :  { %2033 = vmatpush3.bf16.msra.mxu0 %v2032_v34  ;;  %2060 = vmatpush3.bf16.msra.mxu1 %v2059_v35  ;;  %v244_v34 = vld [vmem:[%s2966_s15 + $0x70] sm:$0xff]  ;;  %v245_v35 = vld [vmem:[%s2966_s15 + $0x78] sm:$0xff] }
 0x21f   :  { %2034 = vmatprep.subr.bf16.mxu0 %v2141_v3  ;;  %2061 = vmatprep.subr.bf16.mxu1 %v2141_v3  ;;  %v2101_v36 = vpack.c.bf16 %v245_v35, %v244_v34 }
 0x220   :  { %1766 = vmatprep.mubr.msk.f32.mxu0 %vm2142_vm0, %v2143_v11 }
 0x222   :  { %2036 = vmatpush3.bf16.msra.mxu0 %v2035_v40  ;;  %2063 = vmatpush3.bf16.msra.mxu1 %v2062_v41 }
 0x223   :  { %2037 = vmatprep.subr.bf16.mxu0 %v2141_v3  ;;  %2064 = vmatprep.subr.bf16.mxu1 %v2141_v3 }
 0x226   :  { %2039 = vmatpush3.bf16.msra.mxu0 %v2038_v46  ;;  %2066 = vmatpush3.bf16.msra.mxu1 %v2065_v47 }
 0x227   :  { %2040 = vmatprep.subr.bf16.mxu0 %v2141_v3  ;;  %2067 = vmatprep.subr.bf16.mxu1 %v2141_v3 }
 0x22a   :  { %2042 = vmatpush3.bf16.msra.mxu0 %v2041_v53  ;;  %2069 = vmatpush3.bf16.msra.mxu1 %v2068_v54 }
 0x22b   :  { %2043 = vmatprep.subr.bf16.mxu0 %v2141_v3  ;;  %2070 = vmatprep.subr.bf16.mxu1 %v2141_v3 }
 0x22e   :  { %2045 = vmatpush3.bf16.msra.mxu0 %v2044_v60  ;;  %2072 = vmatpush3.bf16.msra.mxu1 %v2071_v61 }
 0x22f   :  { %2046 = vmatprep.subr.bf16.mxu0 %v2141_v3  ;;  %2073 = vmatprep.subr.bf16.mxu1 %v2141_v3 }
 0x232   :  { %2048 = vmatpush3.bf16.msra.mxu0 %v2047_v4  ;;  %2075 = vmatpush3.bf16.msra.mxu1 %v2074_v5 }
 0x233   :  { %2049 = vmatprep.subr.bf16.mxu0 %v2141_v3  ;;  %2076 = vmatprep.subr.bf16.mxu1 %v2141_v3 }
 0x236   :  { %2051 = vmatpush3.bf16.msra.mxu0 %v2050_v10  ;;  %2078 = vmatpush3.bf16.msra.mxu1 %v2077_v12 }
 0x237   :  { %2052 = vmatprep.subr.bf16.mxu0 %v2141_v3 }
 0x239   :  { %1802 = vmatmul.mubr.f32.vlgmr.msra.gmra.mrb[12].mxu1 %v2527_v55  ;;  %v234_v55 = vld [vmem:[%s2966_s15 + $0x20] sm:$0xff] }
 0x23a   :  { %2054 = vmatpush3.bf16.msra.mxu0 %v2053_v15  ;;  %v2086_v23 = vpack.c.bf16 %v235_v22, %v234_v55 }
 0x23b   :  { %2079 = vmatprep.subr.bf16.mxu0 %v2141_v3 }
 0x23d   :  { %1767 = vmatmul.mubr.f32.vlgmr.msra.gmra.mrb[8].mxu0 %v2545_v63  ;;  %v236_v63 = vld [vmem:[%s2966_s15 + $0x30] sm:$0xff] }
 0x23e   :  { %2081 = vmatpush3.bf16.msra.mxu0 %v2080_v18  ;;  %1836 = vmatprep.mubr.msk.f32.mxu0 %vm2142_vm0, %v2143_v11  ;;  %v237_v11 = vld [vmem:[%s2966_s15 + $0x38] sm:$0xff] }
 0x23f   :  { %2082 = vmatprep.subr.bf16.mxu0 %v2141_v3  ;;  %v2089_v24 = vpack.c.bf16 %v237_v11, %v236_v63 }
 0x242   :  { %2084 = vmatpush3.bf16.msra.mxu0 %v2083_v21 }
 0x243   :  { %2085 = vmatprep.subr.bf16.mxu0 %v2141_v3 }
 0x246   :  { %2087 = vmatpush3.bf16.msra.mxu0 %v2086_v23 }
 0x247   :  { %2088 = vmatprep.subr.bf16.mxu0 %v2141_v3 }
 0x24a   :  { %2090 = vmatpush3.bf16.msra.mxu0 %v2089_v24 }
 0x24b   :  { %2091 = vmatprep.subr.bf16.mxu0 %v2141_v3 }
 0x24e   :  { %2093 = vmatpush3.bf16.msra.mxu0 %v2092_v27 }
 0x24f   :  { %2094 = vmatprep.subr.bf16.mxu0 %v2141_v3 }
 0x252   :  { %2096 = vmatpush3.bf16.msra.mxu0 %v2095_v30 }
 0x253   :  { %2097 = vmatprep.subr.bf16.mxu0 %v2141_v3 }
 0x256   :  { %2099 = vmatpush3.bf16.msra.mxu0 %v2098_v33 }
 0x257   :  { %2100 = vmatprep.subr.bf16.mxu0 %v2141_v3  ;;  %v1247_v3 = vld [vmem:[%s2967_s16] ss:$0 sm:$0xff] }
 0x25a   :  { %2102 = vmatpush3.bf16.msra.mxu0 %v2101_v36 }
 0x25d   :  { %1837 = vmatmul.mubr.f32.vlgmr.msra.gmra.mrb[10].mxu0 %v2369_v50 }
 0x2ac   :  { %v686_v37 = vpop.f32.mrb[6].mxu1 }
 0x2ad   :  { %v1593_v38 = vpop.f32.mrb[7].mxu1 }
 0x2b0   :  { %v616_v39 = vpop.f32.mrb[2].mxu0 }
 0x2b1   :  { %v687_v40 = vadd.f32 %v686_v37, %v616_v39  ;;  %v1558_v41 = vpop.f32.mrb[3].mxu0 }
 0x2cc   :  { %v840_v42 = vpop.f32.mrb[8].mxu1 }
 0x2cd   :  { %v1663_v43 = vpop.f32.mrb[9].mxu1 }
 0x2d0   :  { %v756_v44 = vpop.f32.mrb[4].mxu0 }
 0x2d1   :  { %v760_v45 = vadd.f32 %v756_v44, %v687_v40  ;;  %v1628_v46 = vpop.f32.mrb[5].mxu0 }
 0x2d3   :  { %v767_v57 = vadd.f32 %v1247_v3, %v760_v45 }
 0x2d5   :  { %v1248_v61 = vmul.f32 -1.442695, %v767_v57 }
 0x2d7   :  { %2107 = vpow2.f32 %v1248_v61 }
 0x2e1   :  { %v2108_v2 = vpop.eup %2107 }
 0x2e2   :  { %v771_v4 = vadd.f32 1.0, %v2108_v2 }
 0x2ec   :  { %v980_v47 = vpop.f32.mrb[10].mxu1 }
 0x2ed   :  { %v1733_v48 = vpop.f32.mrb[11].mxu1 }
 0x2f0   :  { %v910_v49 = vpop.f32.mrb[6].mxu0 }
 0x2f1   :  { %v911_v51 = vadd.f32 %v910_v49, %v840_v42  ;;  %v1698_v52 = vpop.f32.mrb[7].mxu0 }
 0x2f3   :  { %v984_v53 = vadd.f32 %v980_v47, %v911_v51 }
 0x2f5   :  { %v991_v0 = vadd.f32 %v1249_v62, %v984_v53 }
 0x2f7   :  { %v1250_v1 = vmul.f32 -1.442695, %v991_v0 }
 0x2f9   :  { %2109 = vpow2.f32 %v1250_v1 }
 0x2fa   :  { %2111 = vrcp.f32 %v771_v4 }
 0x303   :  { %v2110_v5 = vpop.eup %2109 }
 0x304   :  { %v995_v7 = vadd.f32 1.0, %v2110_v5  ;;  %v2112_v13 = vpop.eup %2111 }
 0x306   :  { %2113 = vrcp.f32 %v995_v7 }
 0x30c   :  { %v1134_v54 = vpop.f32.mrb[12].mxu1 }
 0x30d   :  { %v1803_v56 = vpop.f32.mrb[13].mxu1 }
 0x310   :  { %v1064_v58 = vpop.f32.mrb[8].mxu0  ;;  %v2114_v17 = vpop.eup %2113 }
 0x311   :  { %v1135_v59 = vadd.f32 %v1134_v54, %v1064_v58  ;;  %v1768_v60 = vpop.f32.mrb[9].mxu0  ;;  %v1224_v18 = vsub.f32 1.0, %v2114_v17  ;;  %v1226_v21 = vmul.f32 %v2114_v17, %v2369_v50 }
 0x313   :  { %v1144_v14 = vadd.f32 %v1251_v8, %v1135_v59 }
 0x330   :  { %v1217_v9 = vpop.f32.mrb[10].mxu0 }
 0x331   :  { %v1218_v10 = vadd.f32 %v1252_v6, %v1217_v9  ;;  %v1838_v12 = vpop.f32.mrb[11].mxu0 }
 0x333   :  { %v1221_v15 = vmul.f32 %v2112_v13, %v1218_v10 }
 0x335   :  { %v1222_v16 = vadd.f32 %v1221_v15, %v1144_v14 }
 0x337   :  { %2115 = vtanh.f32 %v1222_v16 }
 0x341   :  { %v2116_v19 = vpop.eup %2115 }
 0x342   :  { %v1225_v20 = vmul.f32 %v2116_v19, %v1224_v18 }
 0x344   :  { %v1227_v55 = vadd.f32 %v1226_v21, %v1225_v20 }
 0x346   :  { %1228 = vst [vmem:[#allocation2] sm:$0xff] %v1227_v55 }
 0x347   :  { %2128 = shalt.err (!%p2125_p4)
}
 0x348   :  { %s2129_s30 = scalar_lea.hbm %s2971_s20, 128 }
 0x349   :  { %p2130_p5 = scmp.ne.s32.totalorder %s2971_s20, %s2129_s30  ;;  %p2133_p6 = scmp.lt.u32.totalorder %s2129_s30, %s2971_s20 }
 0x34b   :  { %p2135_p7 = pnand %p2133_p6, %p2130_p5 }
 0x34d   :  { %2138 = shalt.err (!%p2135_p7)
}
 0x34e   :  { %1238 = dma.vmem_to_hbm [thread:$0]  %s1236_s9, 128, %s2971_s20, [#allocation3]  }
 0x34f   :  { %2139 = dma.done.wait [#allocation3], 128  }
 0x350   :  { %2140 = vsyncadd [#allocation3], 4294967168 }
 0x351   :  { %1242 = vsyncpa [#allocation3], 1 }

</bundles_post_ra>
